<compile_context>
chip_gen: v7x
topology: tpu7x:2x2x1
jax: 0.10.0
libtpu: 0.0.40
codegen_flags: <defaults>
</compile_context>

<pallas_src>
import functools

import jax
import jax.numpy as jnp
from jax import lax
from jax.experimental import pallas as pl
from jax.experimental.pallas import tpu as pltpu

BN_EPS = 1e-5
LANE = 128


def _round_up(x, m):
    return (x + m - 1) // m * m


def _pad_axis(a, axis, target, value=0.0):
    pad = target - a.shape[axis]
    if pad == 0:
        return a
    cfg = [(0, 0)] * a.ndim
    cfg[axis] = (0, pad)
    return jnp.pad(a, cfg, constant_values=value)


def _vmem_limit_bytes():
    cap = 128 * 1024 * 1024
    try:
        cap = int(pltpu.get_tpu_info().vmem_capacity_bytes)
    except Exception:
        pass
    # ~3/4 of physical, capped at 100 MiB (v5e/v6e -> ~96 MiB, v7x -> ~48 MiB).
    return int(min(cap * 3 // 4, 100 * 1024 * 1024))


def _pick_row_tile(rows, bytes_per_row, budget_bytes):
    max_rows = max(8, budget_bytes // max(bytes_per_row, 1))
    for t in (8192, 4096, 2048, 1024, 512, 256, 128, 64, 32, 16, 8):
        if t <= max_rows and rows % t == 0:
            return t
    return rows  # tiny / awkward shapes: single grid step


def _pick_image_tile(n, bytes_per_image, budget_bytes):
    best = 1
    for nb in range(1, n + 1):
        if n % nb == 0 and nb * bytes_per_image <= budget_bytes:
            best = nb
    return best


def _bn_scale_shift(stats, count, gamma, beta):
    """One-pass BN finalize: stats=[sum; sumsq] (2,C) f32 -> per-channel scale/shift."""
    mean = stats[0:1] / count
    var = jnp.maximum(stats[1:2] / count - mean * mean, 0.0)
    scale = gamma * lax.rsqrt(var + BN_EPS)
    shift = beta - mean * scale
    return scale, shift


def _row_stats(y):
    """Per-channel [sum; sumsq] of a (rows, C) f32 value -> (1, 2, C)."""
    return jnp.concatenate(
        [jnp.sum(y, axis=0, keepdims=True),
         jnp.sum(y * y, axis=0, keepdims=True)], axis=0)[None]


# ---------------- stage 1: conv_reduce (1x1) + bn_reduce partial statistics ------------
def _reduce_kernel(x_ref, w_ref, y_ref, st_ref):
    y = jnp.dot(x_ref[...], w_ref[...], preferred_element_type=jnp.float32)
    y_ref[...] = y.astype(y_ref.dtype)
    st_ref[...] = _row_stats(y)


# ------- stage 2: bn_reduce+relu -> grouped 3x3 conv (stride s) + bn partial stats -----
def _grouped_conv_kernel(a_ref, sc_ref, sh_ref, w_ref, y_ref, st_ref, apad_ref,
                         *, stride, cardinality, per_group):
    nb, H, W, D = a_ref.shape
    s = stride
    Ho = (H - 1) // s + 1
    Wo = (W - 1) // s + 1
    rows = nb * Ho * Wo
    f32 = jnp.float32
    cdt = apad_ref.dtype  # bf16

    # bn_reduce + relu: one fused multiply-add per element (f32 math, bf16 storage).
    a = jnp.maximum(
        a_ref[...].astype(f32) * sc_ref[...].reshape(1, 1, 1, D)
        + sh_ref[...].reshape(1, 1, 1, D), 0.0).astype(cdt)

    # padding=1 halo: two full-width row strips + one aligned interior store.
    zrow = jnp.zeros((nb, 1, W + 2, D), cdt)
    zcol = jnp.zeros((nb, H, 1, D), cdt)
    apad_ref[:, 0:1, :, :] = zrow
    apad_ref[:, H + 1:H + 2, :, :] = zrow
    apad_ref[:, 1:H + 1, :, :] = jnp.concatenate([zcol, a, zcol], axis=2)

    if s == 1:
        def tap(kh, kw):
            return apad_ref[:, kh:kh + Ho, kw:kw + Wo, :].reshape(rows, D)
    else:
        # TODO(synk): replace the value-level strided slice with strided ref reads
        # (pl.ds(..., stride=s)) / a polyphase decomposition once validated on-device.
        apad_full = apad_ref[...]

        def tap(kh, kw):
            return lax.slice(
                apad_full, (0, kh, kw, 0),
                (nb, kh + (Ho - 1) * s + 1, kw + (Wo - 1) * s + 1, D),
                (1, s, s, 1)).reshape(rows, D)

    conv = None
    if per_group:
        dg = D // cardinality
        for t in range(9):
            p = tap(t // 3, t % 3)
            t_out = jnp.concatenate(
                [jnp.dot(p[:, g * dg:(g + 1) * dg], w_ref[t, g],
                         preferred_element_type=f32) for g in range(cardinality)],
                axis=1)
            conv = t_out if conv is None else conv + t_out
    else:
        for t in range(9):
            t_out = jnp.dot(tap(t // 3, t % 3), w_ref[t], preferred_element_type=f32)
            conv = t_out if conv is None else conv + t_out

    y_ref[...] = conv.reshape(nb, Ho, Wo, D).astype(y_ref.dtype)
    st_ref[...] = _row_stats(conv)


# ------ stage 3: bn+relu -> conv_expand (1x1) [+ shortcut projection] + partial stats --
def _expand_kernel(c_ref, sc_ref, sh_ref, we_ref, b_ref, bst_ref):
    f32 = jnp.float32
    c = jnp.maximum(c_ref[...].astype(f32) * sc_ref[...] + sh_ref[...], 0.0)
    b = jnp.dot(c.astype(we_ref.dtype), we_ref[...], preferred_element_type=f32)
    b_ref[...] = b.astype(b_ref.dtype)
    bst_ref[...] = _row_stats(b)


def _expand_shortcut_kernel(c_ref, sc_ref, sh_ref, we_ref, xs_ref, ws_ref,
                            b_ref, bst_ref, r_ref, rst_ref):
    f32 = jnp.float32
    c = jnp.maximum(c_ref[...].astype(f32) * sc_ref[...] + sh_ref[...], 0.0)
    b = jnp.dot(c.astype(we_ref.dtype), we_ref[...], preferred_element_type=f32)
    b_ref[...] = b.astype(b_ref.dtype)
    bst_ref[...] = _row_stats(b)
    r = jnp.dot(xs_ref[...], ws_ref[...], preferred_element_type=f32)
    r_ref[...] = r.astype(r_ref.dtype)
    rst_ref[...] = _row_stats(r)


# ---------------- stage 4: bn_expand (+ bn_short), residual add, relu ------------------
def _combine_identity_kernel(b_ref, bsc_ref, bsh_ref, xs_ref, o_ref):
    f32 = jnp.float32
    b = b_ref[...].astype(f32) * bsc_ref[...] + bsh_ref[...]
    o_ref[...] = jnp.maximum(b + xs_ref[...].astype(f32), 0.0).astype(o_ref.dtype)


def _combine_proj_kernel(b_ref, bsc_ref, bsh_ref, r_ref, rsc_ref, rsh_ref, o_ref):
    f32 = jnp.float32
    b = b_ref[...].astype(f32) * bsc_ref[...] + bsh_ref[...]
    r = r_ref[...].astype(f32) * rsc_ref[...] + rsh_ref[...]
    o_ref[...] = jnp.maximum(b + r, 0.0).astype(o_ref.dtype)


def cifar_resnext_bottleneck(x, params, *, stride, cardinality, has_shortcut,
                             row_tile=None, image_tile=None):
    N, H, W, Cin = x.shape
    D = params["w_reduce"].shape[1]
    Cout = params["w_expand"].shape[1]
    Dg = D // cardinality
    s = stride
    Ho = (H - 1) // s + 1
    Wo = (W - 1) // s + 1
    if not has_shortcut:
        assert Cin == Cout, "identity shortcut requires in_channels == out_channels"

    Cin_p = _round_up(Cin, LANE)
    D_p = _round_up(D, LANE)
    Cout_p = _round_up(Cout, LANE)
    bf16, f32 = jnp.bfloat16, jnp.float32
    out_dtype = x.dtype

    vmem_limit = _vmem_limit_bytes()
    budget = vmem_limit // 4
    cparams = pltpu.CompilerParams(dimension_semantics=("parallel",),
                                   vmem_limit_bytes=vmem_limit)

    # ---- weights / BN params, lane-padded, matmul operands in bf16 ---------------------
    w_reduce = _pad_axis(_pad_axis(params["w_reduce"], 0, Cin_p), 1, D_p).astype(bf16)
    w_expand = _pad_axis(_pad_axis(params["w_expand"], 0, D_p), 1, Cout_p).astype(bf16)

    per_group = (Dg % LANE == 0) and cardinality > 1
    if per_group:
        # True per-group matmuls: (cardinality, 9, Dg, Dg) -> (9, cardinality, Dg, Dg).
        w_conv = jnp.transpose(params["w_conv"], (1, 0, 2, 3)).astype(bf16)
        wconv_spec = pl.BlockSpec(w_conv.shape, lambda i: (0, 0, 0, 0))
    else:
        # Fold groups into 9 block-diagonal (D, D) taps (good for small Dg).
        w_bd = jnp.zeros((9, D, D), f32)
        for g in range(cardinality):
            w_bd = w_bd.at[:, g * Dg:(g + 1) * Dg, g * Dg:(g + 1) * Dg].set(
                params["w_conv"][g].astype(f32))
        w_conv = _pad_axis(_pad_axis(w_bd, 1, D_p), 2, D_p).astype(bf16)
        wconv_spec = pl.BlockSpec(w_conv.shape, lambda i: (0, 0, 0))

    g_reduce = _pad_axis(params["g_reduce"].astype(f32), 1, D_p, 1.0)
    b_reduce = _pad_axis(params["b_reduce"].astype(f32), 1, D_p)
    g_conv = _pad_axis(params["g_conv"].astype(f32), 1, D_p, 1.0)
    b_conv = _pad_axis(params["b_conv"].astype(f32), 1, D_p)
    g_expand = _pad_axis(params["g_expand"].astype(f32), 1, Cout_p, 1.0)
    b_expand = _pad_axis(params["b_expand"].astype(f32), 1, Cout_p)

    # ---- activations: bf16, lane-padded channels ---------------------------------------
    xb = _pad_axis(x.astype(bf16), 3, Cin_p)
    x_rows = xb.reshape(N * H * W, Cin_p)
    if s == 1:
        xs_rows = x_rows
    else:
        # NOTE: torch only pairs stride>1 with the projection shortcut; identity+stride>1
        # here is a plain spatial subsample (no torch parity for that combination).
        xs_rows = xb[:, ::s, ::s, :].reshape(N * Ho * Wo, Cin_p)

    # ================= stage 1: conv_reduce + bn_reduce partial stats ===================
    rows1 = N * H * W
    tm1 = row_tile if row_tile is not None else _pick_row_tile(
        rows1, (Cin_p + D_p) * 2 * 2, budget)
    assert rows1 % tm1 == 0, "row_tile must divide N*H*W"
    g1 = rows1 // tm1
    a0, st_r = pl.pallas_call(
        _reduce_kernel,
        grid=(g1,),
        in_specs=[pl.BlockSpec((tm1, Cin_p), lambda i: (i, 0)),
                  pl.BlockSpec((Cin_p, D_p), lambda i: (0, 0))],
        out_specs=[pl.BlockSpec((tm1, D_p), lambda i: (i, 0)),
                   pl.BlockSpec((1, 2, D_p), lambda i: (i, 0, 0))],
        out_shape=[jax.ShapeDtypeStruct((rows1, D_p), bf16),
                   jax.ShapeDtypeStruct((g1, 2, D_p), f32)],
        compiler_params=cparams,
    )(x_rows, w_reduce)
    scale_r, shift_r = _bn_scale_shift(jnp.sum(st_r, axis=0), rows1, g_reduce, b_reduce)

    # ================= stage 2: bn_reduce+relu -> grouped 3x3 conv + stats ==============
    per_img = ((H + 2) * (W + 2) + H * W + Ho * Wo) * D_p * 2 * 2
    nb = image_tile if image_tile is not None else _pick_image_tile(N, per_img, budget)
    assert N % nb == 0, "image_tile must divide N"
    g2 = N // nb
    conv_kernel = functools.partial(
        _grouped_conv_kernel, stride=s, cardinality=cardinality, per_group=per_group)
    conv_pre, st_c = pl.pallas_call(
        conv_kernel,
        grid=(g2,),
        in_specs=[pl.BlockSpec((nb, H, W, D_p), lambda i: (i, 0, 0, 0)),
                  pl.BlockSpec((1, D_p), lambda i: (0, 0)),
                  pl.BlockSpec((1, D_p), lambda i: (0, 0)),
                  wconv_spec],
        out_specs=[pl.BlockSpec((nb, Ho, Wo, D_p), lambda i: (i, 0, 0, 0)),
                   pl.BlockSpec((1, 2, D_p), lambda i: (i, 0, 0))],
        out_shape=[jax.ShapeDtypeStruct((N, Ho, Wo, D_p), bf16),
                   jax.ShapeDtypeStruct((g2, 2, D_p), f32)],
        scratch_shapes=[pltpu.VMEM((nb, H + 2, W + 2, D_p), bf16)],
        compiler_params=cparams,
    )(a0.reshape(N, H, W, D_p), scale_r, shift_r, w_conv)
    rows3 = N * Ho * Wo
    scale_c, shift_c = _bn_scale_shift(jnp.sum(st_c, axis=0), rows3, g_conv, b_conv)

    # ============ stage 3: bn+relu -> conv_expand (+ shortcut projection) + stats =======
    tm3 = row_tile if row_tile is not None else _pick_row_tile(
        rows3, (D_p + Cin_p + 2 * Cout_p) * 2 * 2, budget)
    assert rows3 % tm3 == 0, "row_tile must divide N*Ho*Wo"
    g3 = rows3 // tm3
    conv_rows = conv_pre.reshape(rows3, D_p)
    if has_shortcut:
        w_short = _pad_axis(_pad_axis(params["w_short"], 0, Cin_p), 1, Cout_p).astype(bf16)
        g_short = _pad_axis(params["g_short"].astype(f32), 1, Cout_p, 1.0)
        b_short = _pad_axis(params["b_short"].astype(f32), 1, Cout_p)
        bott_pre, st_e, short_pre, st_s = pl.pallas_call(
            _expand_shortcut_kernel,
            grid=(g3,),
            in_specs=[pl.BlockSpec((tm3, D_p), lambda i: (i, 0)),
                      pl.BlockSpec((1, D_p), lambda i: (0, 0)),
                      pl.BlockSpec((1, D_p), lambda i: (0, 0)),
                      pl.BlockSpec((D_p, Cout_p), lambda i: (0, 0)),
                      pl.BlockSpec((tm3, Cin_p), lambda i: (i, 0)),
                      pl.BlockSpec((Cin_p, Cout_p), lambda i: (0, 0))],
            out_specs=[pl.BlockSpec((tm3, Cout_p), lambda i: (i, 0)),
                       pl.BlockSpec((1, 2, Cout_p), lambda i: (i, 0, 0)),
                       pl.BlockSpec((tm3, Cout_p), lambda i: (i, 0)),
                       pl.BlockSpec((1, 2, Cout_p), lambda i: (i, 0, 0))],
            out_shape=[jax.ShapeDtypeStruct((rows3, Cout_p), bf16),
                       jax.ShapeDtypeStruct((g3, 2, Cout_p), f32),
                       jax.ShapeDtypeStruct((rows3, Cout_p), bf16),
                       jax.ShapeDtypeStruct((g3, 2, Cout_p), f32)],
            compiler_params=cparams,
        )(conv_rows, scale_c, shift_c, w_expand, xs_rows, w_short)
        scale_s, shift_s = _bn_scale_shift(jnp.sum(st_s, axis=0), rows3, g_short, b_short)
    else:
        bott_pre, st_e = pl.pallas_call(
            _expand_kernel,
            grid=(g3,),
            in_specs=[pl.BlockSpec((tm3, D_p), lambda i: (i, 0)),
                      pl.BlockSpec((1, D_p), lambda i: (0, 0)),
                      pl.BlockSpec((1, D_p), lambda i: (0, 0)),
                      pl.BlockSpec((D_p, Cout_p), lambda i: (0, 0))],
            out_specs=[pl.BlockSpec((tm3, Cout_p), lambda i: (i, 0)),
                       pl.BlockSpec((1, 2, Cout_p), lambda i: (i, 0, 0))],
            out_shape=[jax.ShapeDtypeStruct((rows3, Cout_p), bf16),
                       jax.ShapeDtypeStruct((g3, 2, Cout_p), f32)],
            compiler_params=cparams,
        )(conv_rows, scale_c, shift_c, w_expand)
    scale_e, shift_e = _bn_scale_shift(jnp.sum(st_e, axis=0), rows3, g_expand, b_expand)

    # ============== stage 4: bn_expand (+ bn_short), residual add, relu =================
    if has_shortcut:
        out2d = pl.pallas_call(
            _combine_proj_kernel,
            grid=(g3,),
            in_specs=[pl.BlockSpec((tm3, Cout_p), lambda i: (i, 0)),
                      pl.BlockSpec((1, Cout_p), lambda i: (0, 0)),
                      pl.BlockSpec((1, Cout_p), lambda i: (0, 0)),
                      pl.BlockSpec((tm3, Cout_p), lambda i: (i, 0)),
                      pl.BlockSpec((1, Cout_p), lambda i: (0, 0)),
                      pl.BlockSpec((1, Cout_p), lambda i: (0, 0))],
            out_specs=pl.BlockSpec((tm3, Cout_p), lambda i: (i, 0)),
            out_shape=jax.ShapeDtypeStruct((rows3, Cout_p), out_dtype),
            compiler_params=cparams,
        )(bott_pre, scale_e, shift_e, short_pre, scale_s, shift_s)
    else:
        out2d = pl.pallas_call(
            _combine_identity_kernel,
            grid=(g3,),
            in_specs=[pl.BlockSpec((tm3, Cout_p), lambda i: (i, 0)),
                      pl.BlockSpec((1, Cout_p), lambda i: (0, 0)),
                      pl.BlockSpec((1, Cout_p), lambda i: (0, 0)),
                      pl.BlockSpec((tm3, Cin_p), lambda i: (i, 0))],
            out_specs=pl.BlockSpec((tm3, Cout_p), lambda i: (i, 0)),
            out_shape=jax.ShapeDtypeStruct((rows3, Cout_p), out_dtype),
            compiler_params=cparams,
        )(bott_pre, scale_e, shift_e, xs_rows)

    out = out2d.reshape(N, Ho, Wo, Cout_p)
    if Cout_p != Cout:
        out = out[..., :Cout]
    return out


def make_params(key, in_channels, out_channels, cardinality, base_width, widen_factor):
    width_ratio = out_channels / (widen_factor * 64.0)
    D = cardinality * int(base_width * width_ratio)
    Dg = D // cardinality
    ks = jax.random.split(key, 10)
    f32 = jnp.float32
    params = {
        # 1x1 convs stored transposed: (Cin, Cout_of_conv)
        "w_reduce": 0.1 * jax.random.normal(ks[0], (in_channels, D), f32),
        "g_reduce": 1.0 + 0.1 * jax.random.normal(ks[1], (1, D), f32),
        "b_reduce": 0.1 * jax.random.normal(ks[2], (1, D), f32),
        # grouped 3x3 conv: (cardinality, 9, Dg_in, Dg_out); tap index = kh*3 + kw
        "w_conv": 0.1 * jax.random.normal(ks[3], (cardinality, 9, Dg, Dg), f32),
        "g_conv": 1.0 + 0.1 * jax.random.normal(ks[4], (1, D), f32),
        "b_conv": 0.1 * jax.random.normal(ks[5], (1, D), f32),
        "w_expand": 0.1 * jax.random.normal(ks[6], (D, out_channels), f32),
        "g_expand": 1.0 + 0.1 * jax.random.normal(ks[7], (1, out_channels), f32),
        "b_expand": 0.1 * jax.random.normal(ks[8], (1, out_channels), f32),
        # shortcut projection (used only when in_channels != out_channels)
        "w_short": 0.1 * jax.random.normal(ks[9], (in_channels, out_channels), f32),
        "g_short": jnp.ones((1, out_channels), f32),
        "b_short": jnp.zeros((1, out_channels), f32),
    }
    return params, D


def reference_forward(x, params, *, stride, cardinality, has_shortcut):
    """Pure-JAX f32 reference with the original per-group formulation."""
    N, H, W, Cin = x.shape
    D = params["w_reduce"].shape[1]
    Dg = D // cardinality
    s = stride
    Ho = (H - 1) // s + 1
    Wo = (W - 1) // s + 1

    def bn(y, g, b, relu):
        m = jnp.mean(y, axis=(0, 1, 2), keepdims=True)
        v = jnp.mean((y - m) ** 2, axis=(0, 1, 2), keepdims=True)
        o = (y - m) * lax.rsqrt(v + BN_EPS) * g.reshape(1, 1, 1, -1) + b.reshape(1, 1, 1, -1)
        return jnp.maximum(o, 0.0) if relu else o

    a = jnp.einsum("nhwc,cd->nhwd", x, params["w_reduce"])
    a = bn(a, params["g_reduce"], params["b_reduce"], True)
    ap = jnp.pad(a, ((0, 0), (1, 1), (1, 1), (0, 0)))
    conv = jnp.zeros((N, Ho, Wo, D), jnp.float32)
    for g in range(cardinality):
        acc = jnp.zeros((N, Ho, Wo, Dg), jnp.float32)
        for kh in range(3):
            for kw in range(3):
                patch = ap[:, kh:kh + (Ho - 1) * s + 1:s,
                           kw:kw + (Wo - 1) * s + 1:s, g * Dg:(g + 1) * Dg]
                acc = acc + jnp.einsum("nhwc,cd->nhwd", patch,
                                       params["w_conv"][g, kh * 3 + kw])
        conv = conv.at[..., g * Dg:(g + 1) * Dg].set(acc)
    conv = bn(conv, params["g_conv"], params["b_conv"], True)
    bott = jnp.einsum("nhwc,cd->nhwd", conv, params["w_expand"])
    bott = bn(bott, params["g_expand"], params["b_expand"], False)
    xs = x[:, ::s, ::s, :][:, :Ho, :Wo, :]
    if has_shortcut:
        res = jnp.einsum("nhwc,cd->nhwd", xs, params["w_short"])
        res = bn(res, params["g_short"], params["b_short"], False)
    else:
        res = xs
    return jnp.maximum(res + bott, 0.0)


if __name__ == "__main__":
    def run(seed, *, in_channels, out_channels, stride, cardinality, base_width,
            widen_factor, N, H, W, row_tile=None, image_tile=None):
        kx, kp = jax.random.split(jax.random.PRNGKey(seed))
        x = jax.random.normal(kx, (N, H, W, in_channels), jnp.float32)  # NHWC layout
        params, _ = make_params(kp, in_channels, out_channels, cardinality,
                                base_width, widen_factor)
        has_shortcut = in_channels != out_channels
        out = cifar_resnext_bottleneck(
            x, params, stride=stride, cardinality=cardinality,
            has_shortcut=has_shortcut, row_tile=row_tile, image_tile=image_tile)
        out = jax.block_until_ready(out)
        Ho = (H - 1) // stride + 1
        Wo = (W - 1) // stride + 1
        assert out.shape == (N, Ho, Wo, out_channels)
        assert bool(jnp.all(out >= 0.0)) and bool(jnp.all(jnp.isfinite(out)))
        ref = reference_forward(x, params, stride=stride, cardinality=cardinality,
                                has_shortcut=has_shortcut)
        err = float(jnp.max(jnp.abs(out.astype(jnp.float32) - ref)))
        assert err < 0.25, f"max abs error vs f32 reference too large: {err}"

    # projection shortcut (in != out), stride 1, default tiling
    run(0, in_channels=32, out_channels=64, stride=1, cardinality=4, base_width=16,
        widen_factor=1, N=2, H=8, W=8)
    # same config with forced small tiles: multi-step grids + cross-tile BN stat reduce
    run(0, in_channels=32, out_channels=64, stride=1, cardinality=4, base_width=16,
        widen_factor=1, N=2, H=8, W=8, row_tile=32, image_tile=1)
    # identity shortcut (in == out), stride 1
    run(1, in_channels=64, out_channels=64, stride=1, cardinality=8, base_width=8,
        widen_factor=1, N=2, H=8, W=8)

    print("KERNEL_OK")
</pallas_src>

<mosaic_0001>
module attributes {stable_mosaic.version = 11 : i64} {
  func.func @_reduce_kernel(%arg0: i32, %arg1: memref<128x128xbf16, #tpu.memory_space<vmem>>, %arg2: memref<128x128xbf16, #tpu.memory_space<vmem>>, %arg3: memref<128x128xbf16, #tpu.memory_space<vmem>>, %arg4: memref<1x2x128xf32, #tpu.memory_space<vmem>>) attributes {dimension_semantics = [#tpu.dimension_semantics<parallel>], iteration_bounds = array<i64: 1>, scalar_prefetch = 0 : i64, scratch_operands = 0 : i64, tpu.core_type = #tpu.core_type<tc>, window_params = [{transform_indices = @transform_0, window_bounds = array<i64: 128, 128>}, {pipeline_mode = #tpu.pipeline_mode<synchronous>, transform_indices = @transform_1, window_bounds = array<i64: 128, 128>}, {transform_indices = @transform_2, window_bounds = array<i64: 128, 128>}, {transform_indices = @transform_3, window_bounds = array<i64: 1, 2, 128>}]} {
    %c0 = arith.constant 0 : index
    %c0_0 = arith.constant 0 : index
    %0 = vector.load %arg1[%c0, %c0_0] : memref<128x128xbf16, #tpu.memory_space<vmem>>, vector<128x128xbf16>
    %c0_1 = arith.constant 0 : index
    %c0_2 = arith.constant 0 : index
    %1 = vector.load %arg2[%c0_1, %c0_2] : memref<128x128xbf16, #tpu.memory_space<vmem>>, vector<128x128xbf16>
    %cst = arith.constant dense<0.000000e+00> : vector<128x128xf32>
    %2 = tpu.matmul %0, %1, %cst {dimension_numbers = #tpu.dot_dimension_numbers<[1], [0], [0], [1], [0, 0, 1, 1], [], []>} : vector<128x128xbf16>, vector<128x128xbf16>, vector<128x128xf32> -> vector<128x128xf32>
    %3 = arith.truncf %2 : vector<128x128xf32> to vector<128x128xbf16>
    %c0_3 = arith.constant 0 : index
    %c0_4 = arith.constant 0 : index
    %4 = vector.load %arg3[%c0_3, %c0_4] : memref<128x128xbf16, #tpu.memory_space<vmem>>, vector<128x128xbf16>
    tpu.vector_store %arg3[%c0_3, %c0_4], %3 {strides = array<i32>} : memref<128x128xbf16, #tpu.memory_space<vmem>>, vector<128x128xbf16>,
    %cst_5 = arith.constant dense<0.000000e+00> : vector<128xf32>
    %5 = vector.multi_reduction <add>, %2, %cst_5 [0] : vector<128x128xf32> to vector<128xf32>
    %6 = vector.shape_cast %5 : vector<128xf32> to vector<1x128xf32>
    %7 = arith.mulf %2, %2 : vector<128x128xf32>
    %cst_6 = arith.constant dense<0.000000e+00> : vector<128xf32>
    %8 = vector.multi_reduction <add>, %7, %cst_6 [0] : vector<128x128xf32> to vector<128xf32>
    %9 = vector.shape_cast %8 : vector<128xf32> to vector<1x128xf32>
    %10 = tpu.concatenate %6, %9 in 0 : vector<1x128xf32>, vector<1x128xf32> -> vector<2x128xf32>
    %11 = vector.shape_cast %10 : vector<2x128xf32> to vector<1x2x128xf32>
    %c0_7 = arith.constant 0 : index
    %c0_8 = arith.constant 0 : index
    %c0_9 = arith.constant 0 : index
    %12 = vector.load %arg4[%c0_7, %c0_8, %c0_9] : memref<1x2x128xf32, #tpu.memory_space<vmem>>, vector<1x2x128xf32>
    tpu.vector_store %arg4[%c0_7, %c0_8, %c0_9], %11 {strides = array<i32>} : memref<1x2x128xf32, #tpu.memory_space<vmem>>, vector<1x2x128xf32>,
    return
  }
  func.func @transform_0(%arg0: i32) -> (i32, i32) {
    %c0_i32 = arith.constant 0 : i32
    %c0_i32_0 = arith.constant 0 : i32
    return %arg0, %c0_i32 : i32, i32
  }
  func.func @transform_1(%arg0: i32) -> (i32, i32) {
    %c0_i32 = arith.constant 0 : i32
    %c0_i32_0 = arith.constant 0 : i32
    %c0_i32_1 = arith.constant 0 : i32
    return %c0_i32, %c0_i32_0 : i32, i32
  }
  func.func @transform_2(%arg0: i32) -> (i32, i32) {
    %c0_i32 = arith.constant 0 : i32
    %c0_i32_0 = arith.constant 0 : i32
    return %arg0, %c0_i32 : i32, i32
  }
  func.func @transform_3(%arg0: i32) -> (i32, i32, i32) {
    %c0_i32 = arith.constant 0 : i32
    %c0_i32_0 = arith.constant 0 : i32
    %c0_i32_1 = arith.constant 0 : i32
    return %arg0, %c0_i32, %c0_i32_0 : i32, i32, i32
  }
}

</mosaic_0001>

<bundles_post_ra>
// kernel: tpu_custom_call.1
= control target key start
LH: loop header
LB: loop body
LE: loop exit
PB: predicated region body
PF: predicated region fallthrough
CT: control target
= control target key end

     0   :  { %9 = vsyncpa [#allocation3], 0  ;;  %s826_s0 = inlined_call_operand.hbm [shape: bf16[128,128], index: 0, kind: input, shape index: {}]   ;;  %s827_s1 = inlined_call_operand.hbm [shape: bf16[128,128], index: 1, kind: input, shape index: {}]   ;;  %s828_s2 = inlined_call_operand.hbm [shape: bf16[128,128], index: 2, kind: output, shape index: {0}]   ;;  %s829_s3 = inlined_call_operand.hbm [shape: f32[1,2,128], index: 3, kind: output, shape index: {1}]  }
   0x1   :  { %10 = vsyncpa [#allocation6], 0 }
   0x2   :  { %11 = vsyncpa [#allocation4], 0 }
   0x3   :  { %12 = vsyncpa [#allocation9], 0  ;;  %s719_s12 = smov [#allocation2]   ;;  %s623_s16 = scalar_lea.hbm %s826_s0, 1024 }
   0x4   :  { %s18_s13 = sshll.u32 %s719_s12, 4  ;;  %p624_p0 = scmp.ne.s32.totalorder %s826_s0, %s623_s16  ;;  %s19_s13 = int_to_ptr.vmem [resolvable:$true] %s18_s13 }
   0x5   :  { %p627_p1 = scmp.lt.u32.totalorder %s623_s16, %s826_s0 }
   0x7   :  { %p629_p2 = pnand %p627_p1, %p624_p0 }
   0x9   :  { %632 = shalt.err (!%p629_p2)
}
   0xa   :  { %s633_s21 = scalar_lea.vmem %s19_s13, 1024  ;;  %p638_p4 = scmp.lt.s32.totalorder %s19_s13, %s19_s13 }
   0xb   :  { %p634_p3 = scmp.ne.s32.totalorder %s19_s13, %s633_s21  ;;  %p639_p5 = scmp.lt.s32.totalorder %s633_s21, %s633_s21 }
   0xd   :  { %p640_p6 = por %p639_p5, %p638_p4 }
   0xf   :  { %p641_p7 = pnand %p640_p6, %p634_p3 }
  0x11   :  { %644 = shalt.err (!%p641_p7)
}
  0x12   :  { %s720_s22 = smov 64   ;;  %s721_s23 = smov 4  }
  0x13   :  { %24 = dma.hbm_to_vmem [thread:$0]  %s826_s0, 1024, %s19_s13, [#allocation3], %s720_s22, %s720_s22, %s721_s23  }
  0x14   :  { %s722_s26 = smov [#allocation5]   ;;  %s645_s30 = scalar_lea.hbm %s827_s1, 1024 }
  0x15   :  { %s30_s27 = sshll.u32 %s722_s26, 4  ;;  %p646_p8 = scmp.ne.s32.totalorder %s827_s1, %s645_s30  ;;  %s31_s27 = int_to_ptr.vmem [resolvable:$true] %s30_s27 }
  0x16   :  { %p649_p9 = scmp.lt.u32.totalorder %s645_s30, %s827_s1 }
  0x18   :  { %p651_p10 = pnand %p649_p9, %p646_p8 }
  0x1a   :  { %654 = shalt.err (!%p651_p10)
}
  0x1b   :  { %s655_s8 = scalar_lea.vmem %s31_s27, 1024  ;;  %p660_p12 = scmp.lt.s32.totalorder %s31_s27, %s31_s27 }
  0x1c   :  { %p656_p11 = scmp.ne.s32.totalorder %s31_s27, %s655_s8  ;;  %p661_p13 = scmp.lt.s32.totalorder %s655_s8, %s655_s8 }
  0x1e   :  { %p662_p0 = por %p661_p13, %p660_p12 }
  0x20   :  { %p663_p1 = pnand %p662_p0, %p656_p11 }
  0x22   :  { %666 = shalt.err (!%p663_p1)
}
  0x23   :  { %36 = dma.hbm_to_vmem [thread:$0]  %s827_s1, 1024, %s31_s27, [#allocation6], %s720_s22, %s720_s22, %s721_s23  }
  0x24   :  { %711 = dma.done.wait [#allocation3], 1024  }
  0x25   :  { %712 = vsyncadd [#allocation3], 4294966272 }
  0x26   :  { %713 = dma.done.wait [#allocation6], 1024  }
  0x27   :  { %714 = vsyncadd [#allocation6], 4294966272  ;;  %v607_v0 = vld [vmem:[#allocation5] sm:$0xff]   ;;  %v608_v1 = vld [vmem:[#allocation5 + $0x8] sm:$0xff]   ;;  %s723_s1 = smov [#allocation7]  }
  0x28   :  { %553 = vmatprep.subr.bf16.mxu0 %v607_v0  ;;  %585 = vmatprep.subr.bf16.mxu1 %v607_v0  ;;  %v609_v2 = vld [vmem:[#allocation5 + $0x10] sm:$0xff]   ;;  %v610_v3 = vld [vmem:[#allocation5 + $0x18] sm:$0xff]   ;;  %v615_v4 = vld [vmem:[#allocation2] sm:$0xff]   ;;  %s415_s10 = sshll.u32 %s723_s1, 4  ;;  %s416_s10 = int_to_ptr.vmem [resolvable:$true] %s415_s10 }
  0x29   :  { %554 = vmatpush3.bf16.msra.mxu0 %v607_v0  ;;  %593 = vmatpush3.bf16.msra.mxu1 %v607_v0  ;;  %v611_v5 = vld [vmem:[#allocation5 + $0x20] sm:$0xff]   ;;  %v612_v7 = vld [vmem:[#allocation5 + $0x28] sm:$0xff]   ;;  %v613_v8 = vld [vmem:[#allocation5 + $0x30] sm:$0xff]   ;;  %s667_s11 = scalar_lea.vmem %s416_s10, 1024  ;;  %p672_p3 = scmp.lt.s32.totalorder %s416_s10, %s416_s10 }
  0x2a   :  { %555 = vmatprep.subr.bf16.mxu0 %v608_v1  ;;  %586 = vmatprep.subr.bf16.mxu1 %v608_v1  ;;  %v619_v6 = vld [vmem:[#allocation2 + $0x20] sm:$0xff]   ;;  %v614_v9 = vld [vmem:[#allocation5 + $0x38] sm:$0xff]   ;;  %v616_v10 = vld [vmem:[#allocation2 + $0x8] sm:$0xff]   ;;  %p668_p2 = scmp.ne.s32.totalorder %s416_s10, %s667_s11  ;;  %p673_p4 = scmp.lt.s32.totalorder %s667_s11, %s667_s11 }
  0x2b   :  { %569 = vmatprep.mubr.bf16.mxu0 %v615_v4  ;;  %577 = vmatprep.mubr.bf16.mxu1 %v619_v6  ;;  %v620_v11 = vld [vmem:[#allocation2 + $0x28] sm:$0xff]   ;;  %v617_v12 = vld [vmem:[#allocation2 + $0x10] sm:$0xff]   ;;  %v618_v14 = vld [vmem:[#allocation2 + $0x18] sm:$0xff]  }
  0x2c   :  { %v621_v13 = vld [vmem:[#allocation2 + $0x30] sm:$0xff]   ;;  %v622_v15 = vld [vmem:[#allocation2 + $0x38] sm:$0xff]   ;;  %p674_p5 = por %p673_p4, %p672_p3 }
  0x2d   :  { %556 = vmatpush3.bf16.msra.mxu0 %v608_v1  ;;  %594 = vmatpush3.bf16.msra.mxu1 %v608_v1 }
  0x2e   :  { %557 = vmatprep.subr.bf16.mxu0 %v609_v2  ;;  %587 = vmatprep.subr.bf16.mxu1 %v609_v2  ;;  %p675_p6 = pnand %p674_p5, %p668_p2 }
  0x31   :  { %558 = vmatpush3.bf16.msra.mxu0 %v609_v2  ;;  %595 = vmatpush3.bf16.msra.mxu1 %v609_v2 }
  0x32   :  { %559 = vmatprep.subr.bf16.mxu0 %v610_v3  ;;  %588 = vmatprep.subr.bf16.mxu1 %v610_v3 }
  0x35   :  { %560 = vmatpush3.bf16.msra.mxu0 %v610_v3  ;;  %596 = vmatpush3.bf16.msra.mxu1 %v610_v3 }
  0x36   :  { %561 = vmatprep.subr.bf16.mxu0 %v611_v5  ;;  %589 = vmatprep.subr.bf16.mxu1 %v611_v5 }
  0x39   :  { %562 = vmatpush3.bf16.msra.mxu0 %v611_v5  ;;  %597 = vmatpush3.bf16.msra.mxu1 %v611_v5 }
  0x3a   :  { %563 = vmatprep.subr.bf16.mxu0 %v612_v7  ;;  %590 = vmatprep.subr.bf16.mxu1 %v612_v7 }
  0x3d   :  { %564 = vmatpush3.bf16.msra.mxu0 %v612_v7  ;;  %598 = vmatpush3.bf16.msra.mxu1 %v612_v7 }
  0x3e   :  { %565 = vmatprep.subr.bf16.mxu0 %v613_v8  ;;  %591 = vmatprep.subr.bf16.mxu1 %v613_v8 }
  0x41   :  { %566 = vmatpush3.bf16.msra.mxu0 %v613_v8  ;;  %599 = vmatpush3.bf16.msra.mxu1 %v613_v8 }
  0x42   :  { %567 = vmatprep.subr.bf16.mxu0 %v614_v9  ;;  %592 = vmatprep.subr.bf16.mxu1 %v614_v9 }
  0x45   :  { %568 = vmatpush3.bf16.msra.mxu0 %v614_v9  ;;  %600 = vmatpush3.bf16.msra.mxu1 %v614_v9 }
  0x48   :  { %570 = vmatmul.mubr.bf16.vlgmr.msra.gmra.mrb[0].mxu0 %v616_v10  ;;  %578 = vmatmul.mubr.bf16.vlgmr.msra.gmra.mrb[0].mxu1 %v620_v11 }
  0x49   :  { %573 = vmatprep.mubr.bf16.mxu0 %v617_v12  ;;  %581 = vmatprep.mubr.bf16.mxu1 %v621_v13 }
  0x50   :  { %574 = vmatmul.mubr.bf16.gmra.mrb[4].mxu0 %v618_v14  ;;  %582 = vmatmul.mubr.bf16.gmra.mrb[4].mxu1 %v622_v15 }
 0x11b   :  { %v571_v16 = vpop.f32.mrb[0].mxu0  ;;  %v775_v17 = vpop.f32.mrb[0].mxu1 }
 0x11c   :  { %v206_v18 = vpop.f32.mrb[1].mxu0  ;;  %v777_v19 = vpop.f32.mrb[1].mxu1  ;;  %v372_v31 = vmul.f32 %v571_v16, %v571_v16 }
 0x11d   :  { %v572_v20 = vpop.f32.mrb[2].mxu0  ;;  %v779_v21 = vpop.f32.mrb[2].mxu1  ;;  %v370_v22 = vmul.f32 %v206_v18, %v206_v18  ;;  %v378_v61 = vmul.f32 %v777_v19, %v777_v19 }
 0x11e   :  { %v498_v23 = vpack.c.bf16 %v572_v20, %v571_v16  ;;  %v209_v24 = vpop.f32.mrb[3].mxu0  ;;  %v518_v25 = vpack.c.bf16 %v779_v21, %v775_v17  ;;  %v783_v26 = vpop.f32.mrb[3].mxu1  ;;  %v373_v34 = vmul.f32 %v572_v20, %v572_v20 }
 0x11f   :  { %v493_v27 = vpack.c.bf16 %v209_v24, %v206_v18  ;;  %v349_v28 = vadd.f32 %v209_v24, %v206_v18  ;;  %v371_v29 = vmul.f32 %v209_v24, %v209_v24  ;;  %v513_v30 = vpack.c.bf16 %v783_v26, %v777_v19 }
 0x120   :  { %530 = vst [vmem:[#allocation7 + $0x8] sm:$0xff] %v498_v23   ;;  %534 = vst [vmem:[#allocation7 + $0x28] sm:$0xff] %v518_v25  }
 0x121   :  { %494 = vst [vmem:[#allocation7] sm:$0xff] %v493_v27   ;;  %v350_v32 = vadd.f32 %v571_v16, %v349_v28  ;;  %v386_v33 = vadd.f32 %v371_v29, %v370_v22  ;;  %533 = vst [vmem:[#allocation7 + $0x20] sm:$0xff] %v513_v30  }
 0x123   :  { %v387_v35 = vadd.f32 %v386_v33, %v372_v31  ;;  %v575_v36 = vpop.f32.mrb[4].mxu0  ;;  %v351_v37 = vadd.f32 %v572_v20, %v350_v32  ;;  %v583_v38 = vpop.f32.mrb[4].mxu1 }
 0x124   :  { %v222_v39 = vpop.f32.mrb[5].mxu0  ;;  %v254_v40 = vpop.f32.mrb[5].mxu1  ;;  %v376_v55 = vmul.f32 %v575_v36, %v575_v36 }
 0x125   :  { %v352_v41 = vadd.f32 %v351_v37, %v222_v39  ;;  %v374_v42 = vmul.f32 %v222_v39, %v222_v39  ;;  %v388_v43 = vadd.f32 %v387_v35, %v373_v34  ;;  %v576_v44 = vpop.f32.mrb[6].mxu0  ;;  %v584_v45 = vpop.f32.mrb[6].mxu1 }
 0x126   :  { %v508_v46 = vpack.c.bf16 %v576_v44, %v575_v36  ;;  %v225_v47 = vpop.f32.mrb[7].mxu0  ;;  %v528_v48 = vpack.c.bf16 %v584_v45, %v583_v38  ;;  %v257_v49 = vpop.f32.mrb[7].mxu1  ;;  %v377_v58 = vmul.f32 %v576_v44, %v576_v44 }
 0x127   :  { %v389_v50 = vadd.f32 %v388_v43, %v374_v42  ;;  %v503_v51 = vpack.c.bf16 %v225_v47, %v222_v39  ;;  %v353_v52 = vadd.f32 %v352_v41, %v225_v47  ;;  %v375_v53 = vmul.f32 %v225_v47, %v225_v47 }
 0x128   :  { %532 = vst [vmem:[#allocation7 + $0x18] sm:$0xff] %v508_v46   ;;  %536 = vst [vmem:[#allocation7 + $0x38] sm:$0xff] %v528_v48   ;;  %v523_v54 = vpack.c.bf16 %v257_v49, %v254_v40 }
 0x129   :  { %531 = vst [vmem:[#allocation7 + $0x10] sm:$0xff] %v503_v51   ;;  %v354_v56 = vadd.f32 %v575_v36, %v353_v52  ;;  %v390_v57 = vadd.f32 %v389_v50, %v375_v53 }
 0x12a   :  { %535 = vst [vmem:[#allocation7 + $0x30] sm:$0xff] %v523_v54  }
 0x12b   :  { %v391_v59 = vadd.f32 %v390_v57, %v376_v55  ;;  %v355_v60 = vadd.f32 %v576_v44, %v354_v56 }
 0x12c   :  { %678 = shalt.err (!%p675_p6)
}
 0x12d   :  { %s679_s14 = scalar_lea.hbm %s828_s2, 1024 }
 0x12e   :  { %p680_p7 = scmp.ne.s32.totalorder %s828_s2, %s679_s14  ;;  %p683_p8 = scmp.lt.u32.totalorder %s679_s14, %s828_s2 }
 0x130   :  { %p685_p9 = pnand %p683_p8, %p680_p7 }
 0x132   :  { %688 = shalt.err (!%p685_p9)
}
 0x133   :  { %421 = dma.vmem_to_hbm [thread:$0]  %s416_s10, 1024, %s828_s2, [#allocation4], %s720_s22, %s720_s22, %s721_s23   ;;  %v356_v62 = vadd.f32 %v355_v60, %v777_v19  ;;  %v392_v63 = vadd.f32 %v391_v59, %v377_v58  ;;  %v379_v2 = vmul.f32 %v783_v26, %v783_v26  ;;  %v380_v3 = vmul.f32 %v775_v17, %v775_v17 }
 0x134   :  { %v381_v6 = vmul.f32 %v779_v21, %v779_v21  ;;  %v382_v9 = vmul.f32 %v254_v40, %v254_v40  ;;  %v383_v14 = vmul.f32 %v257_v49, %v257_v49  ;;  %v384_v15 = vmul.f32 %v583_v38, %v583_v38  ;;  %s724_s2 = smov [#allocation8]  }
 0x135   :  { %v393_v0 = vadd.f32 %v392_v63, %v378_v61  ;;  %v357_v1 = vadd.f32 %v356_v62, %v783_v26  ;;  %v385_v19 = vmul.f32 %v584_v45, %v584_v45  ;;  %s428_s21 = sshll.u32 %s724_s2, 4  ;;  %vm407_vm0 = vcmask 1040384   ;;  %s429_s21 = int_to_ptr.vmem [resolvable:$true] %s428_s21 }
 0x136   :  { %s689_s22 = scalar_lea.vmem %s429_s21, 32  ;;  %p694_p11 = scmp.lt.s32.totalorder %s429_s21, %s429_s21 }
 0x137   :  { %v358_v4 = vadd.f32 %v775_v17, %v357_v1  ;;  %v394_v5 = vadd.f32 %v393_v0, %v379_v2  ;;  %p690_p10 = scmp.ne.s32.totalorder %s429_s21, %s689_s22  ;;  %p695_p12 = scmp.lt.s32.totalorder %s689_s22, %s689_s22 }
 0x139   :  { %v395_v7 = vadd.f32 %v394_v5, %v380_v3  ;;  %v359_v8 = vadd.f32 %v779_v21, %v358_v4  ;;  %p696_p13 = por %p695_p12, %p694_p11 }
 0x13b   :  { %v360_v10 = vadd.f32 %v359_v8, %v254_v40  ;;  %v396_v11 = vadd.f32 %v395_v7, %v381_v6  ;;  %p697_p0 = pnand %p696_p13, %p690_p10 }
 0x13d   :  { %v397_v12 = vadd.f32 %v396_v11, %v382_v9  ;;  %v361_v13 = vadd.f32 %v360_v10, %v257_v49 }
 0x13f   :  { %v362_v16 = vadd.f32 %v583_v38, %v361_v13  ;;  %v398_v18 = vadd.f32 %v397_v12, %v383_v14 }
 0x141   :  { %v363_v20 = vadd.f32 %v584_v45, %v362_v16  ;;  %v399_v22 = vadd.f32 %v398_v18, %v384_v15 }
 0x143   :  { %v364_v17 = vrot.slane %v363_v20, 4  ;;  %v400_v23 = vadd.f32 %v399_v22, %v385_v19 }
 0x145   :  { %v365_v24 = vadd.f32 %v364_v17, %v363_v20  ;;  %v401_v25 = vrot.slane %v400_v23, 4 }
 0x147   :  { %v366_v26 = vrot.slane %v365_v24, 2  ;;  %v402_v27 = vadd.f32 %v401_v25, %v400_v23 }
 0x149   :  { %v367_v28 = vadd.f32 %v366_v26, %v365_v24  ;;  %v403_v21 = vrot.slane %v402_v27, 2 }
 0x14b   :  { %v368_v29 = vrot.slane %v367_v28, 1  ;;  %v404_v30 = vadd.f32 %v403_v21, %v402_v27 }
 0x14d   :  { %v405_v31 = vrot.slane %v404_v30, 1  ;;  %v369_v32 = vadd.f32 %v368_v29, %v367_v28 }
 0x14f   :  { %v406_v33 = vadd.f32 %v405_v31, %v404_v30 }
 0x151   :  { %v408_v34 = vsel %vm407_vm0, %v369_v32, %v406_v33 }
 0x152   :  { %409 = vst [vmem:[#allocation8] sm:$0x3] %v408_v34 }
 0x153   :  { %700 = shalt.err (!%p697_p0)
}
 0x154   :  { %s701_s25 = scalar_lea.hbm %s829_s3, 32 }
 0x155   :  { %p702_p1 = scmp.ne.s32.totalorder %s829_s3, %s701_s25  ;;  %p705_p2 = scmp.lt.u32.totalorder %s701_s25, %s829_s3 }
 0x157   :  { %p707_p3 = pnand %p705_p2, %p702_p1 }
 0x159   :  { %710 = shalt.err (!%p707_p3)
}
 0x15a   :  { %431 = dma.vmem_to_hbm [thread:$0]  %s429_s21, 32, %s829_s3, [#allocation9]  }
 0x15b   :  { %715 = dma.done.wait [#allocation4], 1024  }
 0x15c   :  { %716 = vsyncadd [#allocation4], 4294966272 }
 0x15d   :  { %717 = dma.done.wait [#allocation9], 32  }
 0x15e   :  { %718 = vsyncadd [#allocation9], 4294967264 }
 0x15f   :  { %438 = vsyncpa [#allocation3], 1 }
 0x160   :  { %439 = vsyncpa [#allocation6], 1 }
 0x161   :  { %440 = vsyncpa [#allocation4], 1 }
 0x162   :  { %441 = vsyncpa [#allocation9], 1 }

</bundles_post_ra>
